<compile_context>
chip_gen: v6e
topology: v6e:2x2x1
jax: 0.10.0
libtpu: 0.0.40
codegen_flags: <defaults>
</compile_context>

<pallas_src>
import math
import functools

import jax
import jax.numpy as jnp
from jax.experimental import pallas as pl
from jax.experimental.pallas import tpu as pltpu


VMEM_LIMIT = 64 * 1024 * 1024  # raised scoped-VMEM budget (well under v5e/v6e 128 MiB physical)


# ----------------------------- tiling helper -----------------------------

def _tile(dim, target, align):
    """Use `target` if it evenly divides `dim` and is `align`-aligned, else the full dim."""
    if dim > target and dim % target == 0 and target % align == 0:
        return target
    return dim


# ----------------------------- Pallas kernels -----------------------------

def _linear_kernel(x_ref, w_ref, b_ref, o_ref, acc_ref, *, relu):
    """K-tiled x @ W with f32 accumulator; bias (+ optional ReLU) + dtype cast in the k-epilogue."""
    @pl.when(pl.program_id(2) == 0)
    def _():
        acc_ref[...] = jnp.zeros_like(acc_ref)

    acc_ref[...] += jnp.dot(x_ref[...], w_ref[...], preferred_element_type=jnp.float32)

    @pl.when(pl.program_id(2) == pl.num_programs(2) - 1)
    def _():
        y = acc_ref[...] + b_ref[...]
        if relu:
            y = jnp.maximum(y, 0.0)
        o_ref[...] = y.astype(o_ref.dtype)


def linear(x, w, b, relu=False, out_dtype=jnp.bfloat16):
    """(M, K) bf16 @ (K, N) bf16 + (1, N) f32 -> (M, N) out_dtype."""
    M, K = x.shape
    N = w.shape[1]
    tm = _tile(M, 512, 8)
    tn = _tile(N, 512, 128)
    tk = _tile(K, 1024, 128)
    return pl.pallas_call(
        functools.partial(_linear_kernel, relu=relu),
        out_shape=jax.ShapeDtypeStruct((M, N), out_dtype),
        grid=(M // tm, N // tn, K // tk),
        in_specs=[pl.BlockSpec((tm, tk), lambda i, j, k: (i, k)),
                  pl.BlockSpec((tk, tn), lambda i, j, k: (k, j)),
                  pl.BlockSpec((1, tn), lambda i, j, k: (0, j))],
        out_specs=pl.BlockSpec((tm, tn), lambda i, j, k: (i, j)),
        scratch_shapes=[pltpu.VMEM((tm, tn), jnp.float32)],
        compiler_params=pltpu.CompilerParams(
            dimension_semantics=("parallel", "parallel", "arbitrary"),
            vmem_limit_bytes=VMEM_LIMIT),
    )(x, w, b)


def _mhsa_kernel(qkv_ref, o_ref, *, nheads, scale):
    """All heads of one batch element in one lane-dense (S, 3D) block; static head loop."""
    qkv = qkv_ref[0]                       # (S, 3D) bf16
    d = qkv.shape[-1] // 3
    dh = d // nheads
    outs = []
    for h in range(nheads):
        lo = h * dh
        qh = qkv[:, lo:lo + dh]
        kh = qkv[:, d + lo:d + lo + dh]
        vh = qkv[:, 2 * d + lo:2 * d + lo + dh]
        s = jnp.dot(qh, kh.T, preferred_element_type=jnp.float32) * scale
        s = s - jnp.max(s, axis=-1, keepdims=True)
        p = jnp.exp(s)
        # NOTE: approximate EUP reciprocal; small relative error vs exact softmax division.
        p = p * pl.reciprocal(jnp.sum(p, axis=-1, keepdims=True), approx=True)
        outs.append(jnp.dot(p.astype(vh.dtype), vh, preferred_element_type=jnp.float32))
    o_ref[0] = jnp.concatenate(outs, axis=-1).astype(o_ref.dtype)


def mhsa(qkv, nheads, scale):
    """qkv: (B, S, 3D) bf16 -> (B, S, D) bf16; grid over batch, parallel for megacore."""
    B, S, D3 = qkv.shape
    D = D3 // 3
    # TODO(synk): for v7x (2 TCs) and small B, grid over (B, q_tiles) for more parallel steps.
    return pl.pallas_call(
        functools.partial(_mhsa_kernel, nheads=nheads, scale=scale),
        out_shape=jax.ShapeDtypeStruct((B, S, D), jnp.bfloat16),
        grid=(B,),
        in_specs=[pl.BlockSpec((1, S, D3), lambda b: (b, 0, 0))],
        out_specs=pl.BlockSpec((1, S, D), lambda b: (b, 0, 0)),
        compiler_params=pltpu.CompilerParams(dimension_semantics=("parallel",),
                                             vmem_limit_bytes=VMEM_LIMIT),
    )(qkv)


def _add_layernorm_kernel(x_ref, r_ref, g_ref, b_ref, o_ref, *, eps):
    x = x_ref[...].astype(jnp.float32) + r_ref[...].astype(jnp.float32)   # fused residual, f32 stats
    mu = jnp.mean(x, axis=-1, keepdims=True)
    xc = x - mu
    var = jnp.mean(xc * xc, axis=-1, keepdims=True)
    y = xc * jax.lax.rsqrt(var + eps) * g_ref[...] + b_ref[...]
    o_ref[...] = y.astype(o_ref.dtype)


def add_layernorm(x, r, g, b, eps=1e-5):
    """LayerNorm(x + r) with the residual add fused in; bf16 in/out, f32 statistics."""
    M, D = x.shape
    tm = _tile(M, 512, 8)
    return pl.pallas_call(
        functools.partial(_add_layernorm_kernel, eps=eps),
        out_shape=jax.ShapeDtypeStruct((M, D), jnp.bfloat16),
        grid=(M // tm,),
        in_specs=[pl.BlockSpec((tm, D), lambda i: (i, 0)),
                  pl.BlockSpec((tm, D), lambda i: (i, 0)),
                  pl.BlockSpec((1, D), lambda i: (0, 0)),
                  pl.BlockSpec((1, D), lambda i: (0, 0))],
        out_specs=pl.BlockSpec((tm, D), lambda i: (i, 0)),
        compiler_params=pltpu.CompilerParams(dimension_semantics=("parallel",),
                                             vmem_limit_bytes=VMEM_LIMIT),
    )(x, r, g, b)


def _gate_kernel(x_ref, wg_ref, bg_ref, o_ref):
    """Fused gating: logits = x @ Wg + bg, softmax, GShard top-2 dense combine weights (f32)."""
    logits = jnp.dot(x_ref[...], wg_ref[...], preferred_element_type=jnp.float32) + bg_ref[...]
    m = jnp.max(logits, axis=-1, keepdims=True)
    p = jnp.exp(logits - m)
    probs = p / jnp.sum(p, axis=-1, keepdims=True)
    E = probs.shape[-1]
    col = jax.lax.broadcasted_iota(jnp.int32, probs.shape, 1)
    # top-1 (first-max tie break, matching argmax)
    g1 = jnp.max(probs, axis=-1, keepdims=True)
    i1 = jnp.min(jnp.where(probs == g1, col, E), axis=-1, keepdims=True)
    m1 = (col == i1).astype(probs.dtype)
    # top-2
    probs2 = probs * (1.0 - m1)
    g2 = jnp.max(probs2, axis=-1, keepdims=True)
    i2 = jnp.min(jnp.where(probs2 == g2, col, E), axis=-1, keepdims=True)
    m2 = (col == i2).astype(probs.dtype)
    denom = g1 + g2 + 1e-9
    o_ref[...] = (m1 * g1 + m2 * g2) / denom


def moe_gate(x, wg, bg):
    """(M, D) bf16 -> dense (M, E) f32 top-2 combine weights, one kernel launch."""
    M, D = x.shape
    E = wg.shape[1]
    tm = _tile(M, 512, 8)
    return pl.pallas_call(
        _gate_kernel,
        out_shape=jax.ShapeDtypeStruct((M, E), jnp.float32),
        grid=(M // tm,),
        in_specs=[pl.BlockSpec((tm, D), lambda i: (i, 0)),
                  pl.BlockSpec((D, E), lambda i: (0, 0)),
                  pl.BlockSpec((1, E), lambda i: (0, 0))],
        out_specs=pl.BlockSpec((tm, E), lambda i: (i, 0)),
        compiler_params=pltpu.CompilerParams(dimension_semantics=("parallel",),
                                             vmem_limit_bytes=VMEM_LIMIT),
    )(x, wg, bg)


def _moe_kernel(flags_ref, x_ref, g_ref, w1_ref, b1_ref, w2_ref, b2_ref, o_ref, acc_ref,
                *, nexperts):
    """Grid (m_tile, expert, h_tile).  Scalar-prefetched activity flags skip expert x tile steps
    whose gate column is all zero; f32 accumulator of gate-weighted, H-tiled expert FFN output."""
    i = pl.program_id(0)
    e = pl.program_id(1)
    h = pl.program_id(2)

    @pl.when(jnp.logical_and(e == 0, h == 0))
    def _():
        acc_ref[...] = jnp.zeros_like(acc_ref)

    active = flags_ref[i * nexperts + e] > 0

    @pl.when(active)
    def _():
        hid = jnp.dot(x_ref[...], w1_ref[...], preferred_element_type=jnp.float32) + b1_ref[...]
        hid = jnp.maximum(hid, 0.0)                                   # (tm, tH) f32
        y = jnp.dot(hid.astype(jnp.bfloat16), w2_ref[...],
                    preferred_element_type=jnp.float32)               # (tm, D) f32
        # second bias contributes exactly once per expert: add it on the first h-tile only
        y = y + b2_ref[...] * (h == 0).astype(jnp.float32)
        # select this expert's gate column from the (tm, E) gate block (no wrapper transpose)
        onehot = (jax.lax.broadcasted_iota(jnp.int32, g_ref.shape, 1) == e).astype(jnp.float32)
        gcol = jnp.sum(g_ref[...] * onehot, axis=-1, keepdims=True)   # (tm, 1)
        acc_ref[...] += gcol * y

    @pl.when(jnp.logical_and(e == pl.num_programs(1) - 1, h == pl.num_programs(2) - 1))
    def _():
        o_ref[...] = acc_ref[...].astype(o_ref.dtype)


def moe_ffn(x, gates, w1, b1, w2, b2):
    """x: (M, D) bf16; gates: (M, E) f32 dense top-2 combine weights; experts stored bf16."""
    M, D = x.shape
    E = gates.shape[1]
    H = w1.shape[2]
    tm = _tile(M, 256, 8)
    tH = _tile(H, 1024, 128)      # bound per-step expert weights + (tm, tH) intermediate for v7x
    n_i = M // tm
    # per-(m_tile, expert) activity flags; inactive steps have an all-zero gate column so
    # skipping the FFN there is exact.
    flags = (jnp.max(gates.reshape(n_i, tm, E), axis=1) > 0.0).astype(jnp.int32).reshape(-1)
    return pl.pallas_call(
        functools.partial(_moe_kernel, nexperts=E),
        out_shape=jax.ShapeDtypeStruct((M, D), jnp.bfloat16),
        grid_spec=pltpu.PrefetchScalarGridSpec(
            num_scalar_prefetch=1,
            grid=(n_i, E, H // tH),
            in_specs=[pl.BlockSpec((tm, D), lambda i, e, h, flags: (i, 0)),
                      pl.BlockSpec((tm, E), lambda i, e, h, flags: (i, 0)),
                      pl.BlockSpec((None, D, tH), lambda i, e, h, flags: (e, 0, h)),
                      pl.BlockSpec((None, 1, tH), lambda i, e, h, flags: (e, 0, h)),
                      pl.BlockSpec((None, tH, D), lambda i, e, h, flags: (e, h, 0)),
                      pl.BlockSpec((None, 1, D), lambda i, e, h, flags: (e, 0, 0))],
            out_specs=pl.BlockSpec((tm, D), lambda i, e, h, flags: (i, 0)),
            scratch_shapes=[pltpu.VMEM((tm, D), jnp.float32)]),
        compiler_params=pltpu.CompilerParams(
            dimension_semantics=("parallel", "arbitrary", "arbitrary"),
            vmem_limit_bytes=VMEM_LIMIT),
    )(flags, x, gates, w1, b1, w2, b2)


def _decoder_kernel(x_ref, w_ref, b_ref, o_ref, acc_ref):
    """Decoder matmul with log-softmax fused into the k-epilogue (single lane-padded vocab tile)."""
    @pl.when(pl.program_id(1) == 0)
    def _():
        acc_ref[...] = jnp.zeros_like(acc_ref)

    acc_ref[...] += jnp.dot(x_ref[...], w_ref[...], preferred_element_type=jnp.float32)

    @pl.when(pl.program_id(1) == pl.num_programs(1) - 1)
    def _():
        logits = acc_ref[...] + b_ref[...]        # padded vocab columns carry a -1e30 bias
        m = jnp.max(logits, axis=-1, keepdims=True)
        sh = logits - m
        o_ref[...] = sh - jnp.log(jnp.sum(jnp.exp(sh), axis=-1, keepdims=True))


def decode_logsoftmax(x, w, b):
    """(M, D) bf16 @ (D, V_pad) bf16 + bias -> (M, V_pad) f32 log-probs; V_pad in one tile."""
    M, K = x.shape
    V = w.shape[1]
    assert V % 128 == 0, "vocab must be padded to lane width"
    # TODO(synk): add a two-pass (max/sum) variant once V no longer fits a single VMEM tile.
    tm = _tile(M, 512, 8)
    tk = _tile(K, 1024, 128)
    return pl.pallas_call(
        _decoder_kernel,
        out_shape=jax.ShapeDtypeStruct((M, V), jnp.float32),
        grid=(M // tm, K // tk),
        in_specs=[pl.BlockSpec((tm, tk), lambda i, k: (i, k)),
                  pl.BlockSpec((tk, V), lambda i, k: (k, 0)),
                  pl.BlockSpec((1, V), lambda i, k: (0, 0))],
        out_specs=pl.BlockSpec((tm, V), lambda i, k: (i, 0)),
        scratch_shapes=[pltpu.VMEM((tm, V), jnp.float32)],
        compiler_params=pltpu.CompilerParams(
            dimension_semantics=("parallel", "arbitrary"),
            vmem_limit_bytes=VMEM_LIMIT),
    )(x, w, b)


# ----------------------------- model glue -----------------------------

def positional_encoding(max_len, d_model):
    position = jnp.arange(max_len, dtype=jnp.float32)[:, None]
    div_term = jnp.exp(jnp.arange(0, d_model, 2, dtype=jnp.float32)
                       * (-math.log(10000.0) / d_model))
    pe = jnp.zeros((max_len, 1, d_model), dtype=jnp.float32)
    pe = pe.at[:, 0, 0::2].set(jnp.sin(position * div_term))
    pe = pe.at[:, 0, 1::2].set(jnp.cos(position * div_term))
    return pe


def mha(x, p, nheads):
    """x: (B, S, D) bf16 batch-major -> (B*S, D) bf16. No per-layer transposes."""
    B, S, D = x.shape
    Dh = D // nheads
    qkv = linear(x.reshape(B * S, D), p['in_w'], p['in_b'])      # (B*S, 3D) bf16
    o = mhsa(qkv.reshape(B, S, 3 * D), nheads, scale=1.0 / math.sqrt(Dh))   # (B, S, D) bf16
    return linear(o.reshape(B * S, D), p['out_w'], p['out_b'])   # (B*S, D) bf16


def encoder_layer(x, p, nheads):
    """Post-LN transformer encoder layer (PyTorch default norm_first=False); dropout = identity."""
    B, S, D = x.shape
    x2 = x.reshape(B * S, D)
    a = mha(x, p['attn'], nheads)                                # (B*S, D) bf16
    h = add_layernorm(x2, a, p['ln1_g'], p['ln1_b'])             # fused residual + LN, bf16
    if p['kind'] == 'dense':
        ff = linear(linear(h, p['w1'], p['b1'], relu=True), p['w2'], p['b2'])
    else:
        gates = moe_gate(h, p['wg'], p['bg'])                    # fused linear+softmax+top2 -> (M, E)
        ff = moe_ffn(h, gates, p['ew1'], p['eb1'], p['ew2'], p['eb2'])
    out = add_layernorm(h, ff, p['ln2_g'], p['ln2_b'])           # fused residual + LN, bf16
    return out.reshape(B, S, D)


def simple_moe_forward(params, src, d_model, nheads, ntokens):
    """src: (S, B) int32 token ids -> (S, B, ntokens) f32 log-probs."""
    S, B = src.shape
    x = params['embedding'][src] * math.sqrt(d_model)            # (S, B, D) f32
    x = x + params['pe'][:S]                                     # positional encoding (dropout = identity)
    # one transpose to batch-major bf16; layers then run with zero internal transposes
    x = jnp.transpose(x, (1, 0, 2)).astype(jnp.bfloat16)         # (B, S, D)
    for lp in params['layers']:
        x = encoder_layer(x, lp, nheads)
    logp = decode_logsoftmax(x.reshape(B * S, d_model), params['dec_w'], params['dec_b'])
    v_pad = logp.shape[-1]
    logp = logp.reshape(B, S, v_pad).transpose(1, 0, 2)          # back to (S, B, V_pad)
    return logp[:, :, :ntokens]                                  # drop padded vocab columns


def init_params(key, ntokens, d_model, nheads, nhid, nlayers, nexperts, max_len=64):
    keys = iter(jax.random.split(key, 256))
    bf16 = jnp.bfloat16

    def u(shape, dtype=jnp.float32, a=0.1):
        return jax.random.uniform(next(keys), shape, jnp.float32, -a, a).astype(dtype)

    def attn_params():
        return dict(in_w=u((d_model, 3 * d_model), bf16),
                    in_b=jnp.zeros((1, 3 * d_model), jnp.float32),
                    out_w=u((d_model, d_model), bf16),
                    out_b=jnp.zeros((1, d_model), jnp.float32))

    layers = []
    for _ in range(nlayers):
        # standard nn.TransformerEncoderLayer
        layers.append(dict(
            kind='dense', attn=attn_params(),
            ln1_g=jnp.ones((1, d_model), jnp.float32), ln1_b=jnp.zeros((1, d_model), jnp.float32),
            ln2_g=jnp.ones((1, d_model), jnp.float32), ln2_b=jnp.zeros((1, d_model), jnp.float32),
            w1=u((d_model, nhid), bf16), b1=jnp.zeros((1, nhid), jnp.float32),
            w2=u((nhid, d_model), bf16), b2=jnp.zeros((1, d_model), jnp.float32)))
        # TransformerMoEEncoderLayer with TopKGate(k=2) over nexperts
        layers.append(dict(
            kind='moe', attn=attn_params(),
            ln1_g=jnp.ones((1, d_model), jnp.float32), ln1_b=jnp.zeros((1, d_model), jnp.float32),
            ln2_g=jnp.ones((1, d_model), jnp.float32), ln2_b=jnp.zeros((1, d_model), jnp.float32),
            wg=u((d_model, nexperts), bf16), bg=jnp.zeros((1, nexperts), jnp.float32),
            ew1=u((nexperts, d_model, nhid), bf16), eb1=jnp.zeros((nexperts, 1, nhid), jnp.float32),
            ew2=u((nexperts, nhid, d_model), bf16), eb2=jnp.zeros((nexperts, 1, d_model), jnp.float32)))

    # decoder weights padded to lane width (128) for lane-dense stores; padded bias columns get
    # -1e30 so they vanish under the fused log-softmax and are sliced off in the wrapper.
    v_pad = ((ntokens + 127) // 128) * 128
    dec_w = jnp.zeros((d_model, v_pad), jnp.float32)
    dec_w = dec_w.at[:, :ntokens].set(
        jax.random.uniform(next(keys), (d_model, ntokens), jnp.float32, -0.1, 0.1)).astype(bf16)
    dec_b = jnp.zeros((1, v_pad), jnp.float32).at[:, ntokens:].set(-1e30)

    return dict(
        embedding=u((ntokens, d_model)),                 # nn.init.uniform_(-0.1, 0.1), f32 lookup table
        dec_w=dec_w, dec_b=dec_b,
        pe=positional_encoding(max_len, d_model),
        layers=layers)


if __name__ == "__main__":
    ntokens, d_model, nheads, nhid, nlayers, nexperts = 50, 32, 4, 64, 2, 8
    S, B = 8, 2

    key = jax.random.PRNGKey(0)
    pkey, dkey = jax.random.split(key)
    params = init_params(pkey, ntokens, d_model, nheads, nhid, nlayers, nexperts)
    src = jax.random.randint(dkey, (S, B), 0, ntokens, dtype=jnp.int32)

    out = simple_moe_forward(params, src, d_model, nheads, ntokens)
    out = jax.block_until_ready(out)
    assert out.shape == (S, B, ntokens)
    assert bool(jnp.all(jnp.isfinite(out)))
    # log_softmax rows should sum to ~1 in prob space (padded vocab columns contribute 0)
    assert bool(jnp.allclose(jnp.sum(jnp.exp(out), axis=-1), 1.0, atol=1e-4))
    print("KERNEL_OK")
</pallas_src>

<mosaic_0001>
module attributes {stable_mosaic.version = 11 : i64} {
  func.func @_linear_kernel(%arg0: i32, %arg1: i32, %arg2: i32, %arg3: memref<16x32xbf16, #tpu.memory_space<vmem>>, %arg4: memref<32x96xbf16, #tpu.memory_space<vmem>>, %arg5: memref<1x96xf32, #tpu.memory_space<vmem>>, %arg6: memref<16x96xbf16, #tpu.memory_space<vmem>>, %arg7: memref<16x96xf32, #tpu.memory_space<vmem>>) attributes {dimension_semantics = [#tpu.dimension_semantics<parallel>, #tpu.dimension_semantics<parallel>, #tpu.dimension_semantics<arbitrary>], iteration_bounds = array<i64: 1, 1, 1>, scalar_prefetch = 0 : i64, scratch_operands = 1 : i64, tpu.core_type = #tpu.core_type<tc>, window_params = [{transform_indices = @transform_0, window_bounds = array<i64: 16, 32>}, {transform_indices = @transform_1, window_bounds = array<i64: 32, 96>}, {transform_indices = @transform_2, window_bounds = array<i64: 1, 96>}, {transform_indices = @transform_3, window_bounds = array<i64: 16, 96>}]} {
    %c0_i32 = arith.constant 0 : i32
    %0 = arith.cmpi eq, %arg2, %c0_i32 : i32
    %1 = arith.extui %0 : i1 to i32
    %c0_i32_0 = arith.constant 0 : i32
    %2 = arith.cmpi ne, %1, %c0_i32_0 : i32
    scf.if %2 {
      %cst_10 = arith.constant 0.000000e+00 : f32
      %12 = vector.broadcast %cst_10 : f32 to vector<16x96xf32>
      %c0_11 = arith.constant 0 : index
      %c0_12 = arith.constant 0 : index
      %13 = vector.load %arg7[%c0_11, %c0_12] : memref<16x96xf32, #tpu.memory_space<vmem>>, vector<16x96xf32>
      tpu.vector_store %arg7[%c0_11, %c0_12], %12 {strides = array<i32>} : memref<16x96xf32, #tpu.memory_space<vmem>>, vector<16x96xf32>,
    } else {
    }
    %c0 = arith.constant 0 : index
    %c0_1 = arith.constant 0 : index
    %3 = vector.load %arg7[%c0, %c0_1] : memref<16x96xf32, #tpu.memory_space<vmem>>, vector<16x96xf32>
    %c0_2 = arith.constant 0 : index
    %c0_3 = arith.constant 0 : index
    %4 = vector.load %arg3[%c0_2, %c0_3] : memref<16x32xbf16, #tpu.memory_space<vmem>>, vector<16x32xbf16>
    %c0_4 = arith.constant 0 : index
    %c0_5 = arith.constant 0 : index
    %5 = vector.load %arg4[%c0_4, %c0_5] : memref<32x96xbf16, #tpu.memory_space<vmem>>, vector<32x96xbf16>
    %cst = arith.constant dense<0.000000e+00> : vector<16x96xf32>
    %6 = tpu.matmul %4, %5, %cst {dimension_numbers = #tpu.dot_dimension_numbers<[1], [0], [0], [1], [0, 0, 1, 1], [], []>} : vector<16x32xbf16>, vector<32x96xbf16>, vector<16x96xf32> -> vector<16x96xf32>
    %7 = arith.addf %3, %6 : vector<16x96xf32>
    %c0_6 = arith.constant 0 : index
    %c0_7 = arith.constant 0 : index
    %8 = vector.load %arg7[%c0_6, %c0_7] : memref<16x96xf32, #tpu.memory_space<vmem>>, vector<16x96xf32>
    tpu.vector_store %arg7[%c0_6, %c0_7], %7 {strides = array<i32>} : memref<16x96xf32, #tpu.memory_space<vmem>>, vector<16x96xf32>,
    %c0_i32_8 = arith.constant 0 : i32
    %9 = arith.cmpi eq, %arg2, %c0_i32_8 : i32
    %10 = arith.extui %9 : i1 to i32
    %c0_i32_9 = arith.constant 0 : i32
    %11 = arith.cmpi ne, %10, %c0_i32_9 : i32
    scf.if %11 {
      %c0_10 = arith.constant 0 : index
      %c0_11 = arith.constant 0 : index
      %12 = vector.load %arg7[%c0_10, %c0_11] : memref<16x96xf32, #tpu.memory_space<vmem>>, vector<16x96xf32>
      %c0_12 = arith.constant 0 : index
      %c0_13 = arith.constant 0 : index
      %13 = vector.load %arg5[%c0_12, %c0_13] : memref<1x96xf32, #tpu.memory_space<vmem>>, vector<1x96xf32>
      %14 = vector.broadcast %13 : vector<1x96xf32> to vector<16x96xf32>
      %15 = arith.addf %12, %14 : vector<16x96xf32>
      %16 = arith.truncf %15 : vector<16x96xf32> to vector<16x96xbf16>
      %c0_14 = arith.constant 0 : index
      %c0_15 = arith.constant 0 : index
      %17 = vector.load %arg6[%c0_14, %c0_15] : memref<16x96xbf16, #tpu.memory_space<vmem>>, vector<16x96xbf16>
      tpu.vector_store %arg6[%c0_14, %c0_15], %16 {strides = array<i32>} : memref<16x96xbf16, #tpu.memory_space<vmem>>, vector<16x96xbf16>,
    } else {
    }
    return
  }
  func.func @transform_0(%arg0: i32, %arg1: i32, %arg2: i32) -> (i32, i32) {
    %c0_i32 = arith.constant 0 : i32
    return %arg0, %arg2 : i32, i32
  }
  func.func @transform_1(%arg0: i32, %arg1: i32, %arg2: i32) -> (i32, i32) {
    %c0_i32 = arith.constant 0 : i32
    return %arg2, %arg1 : i32, i32
  }
  func.func @transform_2(%arg0: i32, %arg1: i32, %arg2: i32) -> (i32, i32) {
    %c0_i32 = arith.constant 0 : i32
    %c0_i32_0 = arith.constant 0 : i32
    return %c0_i32, %arg1 : i32, i32
  }
  func.func @transform_3(%arg0: i32, %arg1: i32, %arg2: i32) -> (i32, i32) {
    %c0_i32 = arith.constant 0 : i32
    return %arg0, %arg1 : i32, i32
  }
}

</mosaic_0001>

<bundles_post_ra>
// kernel: tpu_custom_call.1
= control target key start
LH: loop header
LB: loop body
LE: loop exit
PB: predicated region body
PF: predicated region fallthrough
CT: control target
= control target key end

     0   :  { %8 = vsyncpa [#allocation4], 0  ;;  %s317_s0 = inlined_call_operand.hbm [shape: bf16[16,32], index: 0, kind: input, shape index: {}]   ;;  %s318_s1 = inlined_call_operand.hbm [shape: bf16[32,96], index: 1, kind: input, shape index: {}]   ;;  %s319_s2 = inlined_call_operand.vmem [shape: f32[1,96], index: 2, kind: input, shape index: {}]   ;;  %s320_s3 = inlined_call_operand.hbm [shape: bf16[16,96], index: 3, kind: output, shape index: {}]  }
   0x1   :  { %9 = vsyncpa [#allocation7], 0 }
   0x2   :  { %10 = vsyncpa [#allocation5], 0  ;;  %s265_s12 = smov [#allocation3]  }
   0x3   :  { %s16_s13 = sshll.u32 %s265_s12, 4  ;;  %s17_s13 = int_to_ptr.vmem [resolvable:$true] %s16_s13 }
   0x4   :  { %s207_s14 = scalar_lea.vmem %s17_s13, 128  ;;  %p212_p1 = scmp.lt.s32.totalorder %s17_s13, %s17_s13 }
   0x5   :  { %p208_p0 = scmp.ne.s32.totalorder %s17_s13, %s207_s14  ;;  %p213_p2 = scmp.lt.s32.totalorder %s207_s14, %s207_s14 }
   0x7   :  { %p214_p3 = por %p213_p2, %p212_p1 }
   0x9   :  { %p215_p4 = pnand %p214_p3, %p208_p0 }
   0xb   :  { %218 = shalt.err (!%p215_p4)
}
   0xc   :  { %s266_s15 = smov 64   ;;  %s267_s16 = smov 4  }
   0xd   :  { %22 = dma.hbm_to_vmem [thread:$0]  %s317_s0, 128, %s17_s13, [#allocation4], %s266_s15, %s266_s15, %s267_s16  }
   0xe   :  { %s268_s19 = smov [#allocation6]  }
   0xf   :  { %s28_s20 = sshll.u32 %s268_s19, 4  ;;  %s29_s20 = int_to_ptr.vmem [resolvable:$true] %s28_s20 }
  0x10   :  { %s227_s21 = scalar_lea.vmem %s29_s20, 256  ;;  %p232_p6 = scmp.lt.s32.totalorder %s29_s20, %s29_s20 }
  0x11   :  { %p228_p5 = scmp.ne.s32.totalorder %s29_s20, %s227_s21  ;;  %p233_p7 = scmp.lt.s32.totalorder %s227_s21, %s227_s21 }
  0x13   :  { %p234_p8 = por %p233_p7, %p232_p6 }
  0x15   :  { %p235_p9 = pnand %p234_p8, %p228_p5 }
  0x17   :  { %238 = shalt.err (!%p235_p9)
}
  0x18   :  { %34 = dma.hbm_to_vmem [thread:$0]  %s318_s1, 256, %s29_s20, [#allocation7], %s266_s15, %s266_s15, %s267_s16  }
  0x19   :  { %259 = dma.done.wait [#allocation4], 128  }
  0x1a   :  { %260 = vsyncadd [#allocation4], 4294967168 }
  0x1b   :  { %261 = dma.done.wait [#allocation7], 256  }
  0x1c   :  { %262 = vsyncadd [#allocation7], 4294967040  ;;  %vm48_vm0 = vcmask 785408   ;;  %v269_v0 = vmov 0.0   ;;  %vm270_vm1 = vmmov 0   ;;  %v196_v1 = vld [vmem:[#allocation6 + $0x8] sm:$0xff]  }
  0x1d   :  { %49 = vst.msk [vmem:[#allocation2] sm:$0xff] %vm48_vm0, %v269_v0  ;;  %50 = vst.msk [vmem:[#allocation2 + $0x8] sm:$0xff] %vm48_vm0, %v269_v0  ;;  %181 = vmatprep.subr.bf16.mxu0 %v269_v0  ;;  %185 = vmatprep.mubr.msk.bf16.mxu0 %vm270_vm1, %v269_v0  ;;  %v197_v2 = vld [vmem:[#allocation6] sm:$0xff]   ;;  %v198_v3 = vld [vmem:[#allocation3] sm:$0xff]   ;;  %vm76_vm2 = vcmask 261120   ;;  %vm148_vm3 = vcmask 781312  }
  0x1e   :  { %182 = vmatpush3.bf16.msra.mxu0 %v196_v1  ;;  %v173_v12 = vld [vmem:[%s319_s2] ss:$0 sm:$0xff]  ;;  %s271_s24 = smov [#allocation8]  }
  0x1f   :  { %183 = vmatprep.subr.bf16.mxu0 %v269_v0  ;;  %s156_s25 = sshll.u32 %s271_s24, 4  ;;  %s157_s25 = int_to_ptr.vmem [resolvable:$true] %s156_s25 }
  0x20   :  { %s239_s26 = scalar_lea.vmem %s157_s25, 128  ;;  %p244_p11 = scmp.lt.s32.totalorder %s157_s25, %s157_s25 }
  0x21   :  { %p240_p10 = scmp.ne.s32.totalorder %s157_s25, %s239_s26  ;;  %p245_p12 = scmp.lt.s32.totalorder %s239_s26, %s239_s26 }
  0x22   :  { %184 = vmatpush3.bf16.msra.mxu0 %v197_v2 }
  0x23   :  { %p246_p13 = por %p245_p12, %p244_p11 }
  0x24   :  { %v51_v4 = vld [vmem:[#allocation2] sm:$0xff]  ;;  %v52_v8 = vld [vmem:[#allocation2 + $0x8] sm:$0xff] }
  0x25   :  { %186 = vmatmul.mubr.msk.bf16.vlgmr.msra.gmra.mxu0 %vm76_vm2, %v198_v3  ;;  %p247_p0 = pnand %p246_p13, %p240_p10 }
  0xe5   :  { %v114_v5 = vpop.f32.mrf.mxu0 }
  0xe6   :  { %v121_v6 = vadd.f32 %v114_v5, %v51_v4 }
  0xe7   :  { %v187_v7 = vpop.f32.mrf.mxu0 }
  0xe8   :  { %124 = vst.msk [vmem:[#allocation2] sm:$0xff] %vm48_vm0, %v121_v6 }
  0xe9   :  { %v117_v9 = vpop.f32.mrf.mxu0 }
  0xea   :  { %v122_v10 = vadd.f32 %v117_v9, %v52_v8 }
  0xeb   :  { %v188_v11 = vpop.f32.mrf.mxu0 }
  0xec   :  { %125 = vst.msk [vmem:[#allocation2 + $0x8] sm:$0xff] %vm48_vm0, %v122_v10 }
  0xef   :  { %v129_v13 = vld [vmem:[#allocation2] sm:$0xff] }
  0xf0   :  { %v138_v14 = vadd.f32 %v173_v12, %v129_v13 }
  0xf2   :  { %v176_v15 = vpack.c.bf16 %v138_v14, %v138_v14 }
  0xf3   :  { %v130_v16 = vld [vmem:[#allocation2 + $0x8] sm:$0xff] }
  0xf4   :  { %v139_v17 = vadd.f32 %v173_v12, %v130_v16  ;;  %149 = vst.msk [vmem:[#allocation8] sm:$0xf] %vm148_vm3, %v176_v15 }
  0xf6   :  { %v177_v18 = vpack.c.bf16 %v139_v17, %v139_v17 }
  0xf8   :  { %150 = vst.msk [vmem:[#allocation8 + $0x4] sm:$0xf] %vm148_vm3, %v177_v18 }
  0xf9   :  { %250 = shalt.err (!%p247_p0)
}
  0xfa   :  { %162 = dma.vmem_to_hbm [thread:$0]  %s157_s25, 128, %s320_s3, [#allocation5], %s266_s15, %s266_s15, %s267_s16  }
  0xfb   :  { %263 = dma.done.wait [#allocation5], 128  }
  0xfc   :  { %264 = vsyncadd [#allocation5], 4294967168 }
  0xfd   :  { %166 = vsyncpa [#allocation4], 1 }
  0xfe   :  { %167 = vsyncpa [#allocation7], 1 }
  0xff   :  { %168 = vsyncpa [#allocation5], 1 }

</bundles_post_ra>
